<compile_context>
chip_gen: v7x
topology: tpu7x:2x2x1
jax: 0.10.0
libtpu: 0.0.40
codegen_flags: <defaults>
</compile_context>

<pallas_src>
import functools

import jax
import jax.numpy as jnp
from jax.experimental import pallas as pl
from jax.experimental.pallas import tpu as pltpu

_LANES = 128
_SUBLANES = 8


def _word_dropout_kernel(seed_ref, x_ref, out_ref, *, threshold, mask_value):
    x = x_ref[...]
    r, c = x.shape

    # Global flat element index of every position in this tile (int32 math;
    # wraparound is harmless for hashing purposes).
    base = pl.program_id(0) * (r * c)
    row = jax.lax.broadcasted_iota(jnp.int32, (r, c), 0)
    col = jax.lax.broadcasted_iota(jnp.int32, (r, c), 1)
    idx = (base + row * c + col).astype(jnp.uint32)

    # Stateless counter-based hash: murmur3 finalizer keyed by the seed.
    seed = seed_ref[0].astype(jnp.uint32)
    z = idx ^ (seed * jnp.uint32(0x9E3779B9))
    z = (z ^ (z >> jnp.uint32(16))) * jnp.uint32(0x85EBCA6B)
    z = (z ^ (z >> jnp.uint32(13))) * jnp.uint32(0xC2B2AE35)
    z = z ^ (z >> jnp.uint32(16))

    # Bernoulli(p) via unsigned threshold compare; scalar select -> plain vsel.
    drop = z < jnp.uint32(threshold)
    out_ref[...] = jnp.where(drop, jnp.int32(mask_value), x)


def _pick_tile_rows(rows: int, target: int) -> int:
    """Largest (8,128)-legal row tile: full extent, or a pow-2 divisor of rows."""
    target = max(int(target), _SUBLANES)
    if rows <= target:
        return rows                       # full-extent block is always legal
    t = 1
    while t * 2 <= target:
        t *= 2                            # largest power of two <= target
    while rows % t != 0:                  # rows is a multiple of 8, so t >= 8
        t //= 2
    return t


def word_dropout(x, seed, *, p_word_dropout, mask_value=0,
                 p_word_dropout_eval=None, training=True,
                 rows_per_tile=1024, donate_input=False):
    """Element-wise word dropout over an integer token tensor `x`."""
    # Match the PyTorch module: eval p defaults to the training p.
    p_eval = p_word_dropout if p_word_dropout_eval is None else p_word_dropout_eval
    p = p_word_dropout if training else p_eval
    if p <= 0.0:
        return x

    threshold = min(int(round(float(p) * 2.0 ** 32)), 2 ** 32 - 1)

    orig_shape, orig_dtype = x.shape, x.dtype
    flat = x.reshape(-1)
    if flat.dtype != jnp.int32:
        flat = flat.astype(jnp.int32)
    n = flat.shape[0]

    # Lane-dense 2-D view. Pad only when n is not a multiple of 8*128 (rare for
    # token tensors); otherwise the kernel reads/writes x in place, no copies.
    quantum = _SUBLANES * _LANES
    n_pad = pl.cdiv(n, quantum) * quantum
    padded = n_pad != n
    if padded:
        flat = jnp.pad(flat, (0, n_pad - n))
    rows = n_pad // _LANES
    x2d = flat.reshape(rows, _LANES)

    tile_rows = _pick_tile_rows(rows, rows_per_tile)
    grid = (rows // tile_rows,)
    seed_arr = jnp.asarray([seed], dtype=jnp.int32)

    kernel = functools.partial(_word_dropout_kernel, threshold=threshold,
                               mask_value=int(mask_value))

    out2d = pl.pallas_call(
        kernel,
        out_shape=jax.ShapeDtypeStruct((rows, _LANES), jnp.int32),
        grid_spec=pltpu.PrefetchScalarGridSpec(
            num_scalar_prefetch=1,
            grid=grid,
            in_specs=[pl.BlockSpec((tile_rows, _LANES),
                                   lambda i, seed_ref: (i, 0))],
            out_specs=pl.BlockSpec((tile_rows, _LANES),
                                   lambda i, seed_ref: (i, 0)),
        ),
        compiler_params=pltpu.CompilerParams(
            dimension_semantics=("parallel",)),   # stateless hash PRNG -> safe
        cost_estimate=pl.CostEstimate(flops=0, transcendentals=0,
                                      bytes_accessed=2 * rows * _LANES * 4),
        input_output_aliases=({1: 0} if donate_input else {}),
    )(seed_arr, x2d)

    out = out2d
    if padded:
        out = out.reshape(-1)[:n]
    out = out.reshape(orig_shape)
    if out.dtype != orig_dtype:
        out = out.astype(orig_dtype)
    return out


if __name__ == "__main__":
    key = jax.random.PRNGKey(0)
    # Small token-id batch: (batch=2, seq=512) int32 ids in [1, 1000).
    x = jax.random.randint(key, (2, 512), minval=1, maxval=1000, dtype=jnp.int32)

    out = word_dropout(x, seed=1234, p_word_dropout=0.25, mask_value=0,
                       training=True)
    out = jax.block_until_ready(out)

    # Sanity checks: same shape/dtype; every position is either masked to
    # mask_value or unchanged; dropout fraction is in a plausible range.
    assert out.shape == x.shape and out.dtype == x.dtype
    masked = out == 0
    assert bool(jnp.all(jnp.where(masked, True, out == x)))
    frac = float(jnp.mean(masked.astype(jnp.float32)))
    assert 0.10 < frac < 0.45, f"unexpected dropout fraction {frac}"

    print("KERNEL_OK")
</pallas_src>

<mosaic_0001>
module attributes {stable_mosaic.version = 11 : i64} {
  func.func @_word_dropout_kernel(%arg0: i32, %arg1: memref<1xi32, #tpu.memory_space<smem>>, %arg2: memref<8x128xi32, #tpu.memory_space<vmem>>, %arg3: memref<8x128xi32, #tpu.memory_space<vmem>>) attributes {dimension_semantics = [#tpu.dimension_semantics<parallel>], iteration_bounds = array<i64: 1>, scalar_prefetch = 1 : i64, scratch_operands = 0 : i64, tpu.core_type = #tpu.core_type<tc>, window_params = [{transform_indices = @transform_0, window_bounds = array<i64: 8, 128>}, {transform_indices = @transform_1, window_bounds = array<i64: 8, 128>}]} {
    %c0 = arith.constant 0 : index
    %c0_0 = arith.constant 0 : index
    %0 = vector.load %arg2[%c0, %c0_0] : memref<8x128xi32, #tpu.memory_space<vmem>>, vector<8x128xi32>
    %c1024_i32 = arith.constant 1024 : i32
    %1 = arith.muli %arg0, %c1024_i32 : i32
    %2 = tpu.iota {dimensions = array<i32: 0>} : vector<8x128xi32>
    %3 = tpu.iota {dimensions = array<i32: 1>} : vector<8x128xi32>
    %c128_i32 = arith.constant 128 : i32
    %4 = vector.broadcast %c128_i32 : i32 to vector<8x128xi32>
    %5 = arith.muli %2, %4 : vector<8x128xi32>
    %6 = vector.broadcast %1 : i32 to vector<8x128xi32>
    %7 = arith.addi %6, %5 : vector<8x128xi32>
    %8 = arith.addi %7, %3 : vector<8x128xi32>
    %c0_1 = arith.constant 0 : index
    %9 = memref.load %arg1[%c0_1] : memref<1xi32, #tpu.memory_space<smem>>
    %c-1640531527_i32 = arith.constant -1640531527 : i32
    %10 = arith.muli %9, %c-1640531527_i32 : i32
    %11 = vector.broadcast %10 : i32 to vector<8x128xi32>
    %12 = arith.xori %8, %11 : vector<8x128xi32>
    %c16_i32 = arith.constant 16 : i32
    %13 = vector.broadcast %c16_i32 : i32 to vector<8x128xi32>
    %14 = arith.shrui %12, %13 : vector<8x128xi32>
    %15 = arith.xori %12, %14 : vector<8x128xi32>
    %c-2048144789_i32 = arith.constant -2048144789 : i32
    %16 = vector.broadcast %c-2048144789_i32 : i32 to vector<8x128xi32>
    %17 = arith.muli %15, %16 : vector<8x128xi32>
    %c13_i32 = arith.constant 13 : i32
    %18 = vector.broadcast %c13_i32 : i32 to vector<8x128xi32>
    %19 = arith.shrui %17, %18 : vector<8x128xi32>
    %20 = arith.xori %17, %19 : vector<8x128xi32>
    %c-1028477387_i32 = arith.constant -1028477387 : i32
    %21 = vector.broadcast %c-1028477387_i32 : i32 to vector<8x128xi32>
    %22 = arith.muli %20, %21 : vector<8x128xi32>
    %c16_i32_2 = arith.constant 16 : i32
    %23 = vector.broadcast %c16_i32_2 : i32 to vector<8x128xi32>
    %24 = arith.shrui %22, %23 : vector<8x128xi32>
    %25 = arith.xori %22, %24 : vector<8x128xi32>
    %c1073741824_i32 = arith.constant 1073741824 : i32
    %26 = vector.broadcast %c1073741824_i32 : i32 to vector<8x128xi32>
    %27 = arith.cmpi ult, %25, %26 : vector<8x128xi32>
    %c0_i32 = arith.constant 0 : i32
    %28 = vector.broadcast %c0_i32 : i32 to vector<8x128xi32>
    %29 = arith.select %27, %28, %0 : vector<8x128xi1>, vector<8x128xi32>
    %c0_3 = arith.constant 0 : index
    %c0_4 = arith.constant 0 : index
    %30 = vector.load %arg3[%c0_3, %c0_4] : memref<8x128xi32, #tpu.memory_space<vmem>>, vector<8x128xi32>
    tpu.vector_store %arg3[%c0_3, %c0_4], %29 {strides = array<i32>} : memref<8x128xi32, #tpu.memory_space<vmem>>, vector<8x128xi32>,
    return
  }
  func.func @transform_0(%arg0: i32, %arg1: memref<1xi32, #tpu.memory_space<smem>>) -> (i32, i32) {
    %c0_i32 = arith.constant 0 : i32
    %c0_i32_0 = arith.constant 0 : i32
    return %arg0, %c0_i32 : i32, i32
  }
  func.func @transform_1(%arg0: i32, %arg1: memref<1xi32, #tpu.memory_space<smem>>) -> (i32, i32) {
    %c0_i32 = arith.constant 0 : i32
    %c0_i32_0 = arith.constant 0 : i32
    return %arg0, %c0_i32 : i32, i32
  }
}

</mosaic_0001>

<bundles_post_ra>
// kernel: tpu_custom_call.1
= control target key start
LH: loop header
LB: loop body
LE: loop exit
PB: predicated region body
PF: predicated region fallthrough
CT: control target
= control target key end

     0   :  { %8 = vsyncpa [#allocation5], 0  ;;  %s157_s0 = inlined_call_operand.<no memory space> [shape: s32[1], index: 0, kind: input, shape index: {}]   ;;  %s158_s1 = inlined_call_operand.hbm [shape: s32[8,128], index: 1, kind: input, shape index: {}]   ;;  %s159_s2 = inlined_call_operand.hbm [shape: s32[8,128], index: 2, kind: output, shape index: {}]  }
   0x1   :  { %9 = vsyncpa [#allocation6], 0  ;;  %s113_s9 = smov [#allocation4]   ;;  %s65_s13 = scalar_lea.hbm %s158_s1, 128 }
   0x2   :  { %s16_s10 = sshll.u32 %s113_s9, 4  ;;  %p66_p0 = scmp.ne.s32.totalorder %s158_s1, %s65_s13  ;;  %s17_s10 = int_to_ptr.vmem [resolvable:$true] %s16_s10 }
   0x3   :  { %p69_p1 = scmp.lt.u32.totalorder %s65_s13, %s158_s1 }
   0x5   :  { %p71_p2 = pnand %p69_p1, %p66_p0 }
   0x7   :  { %74 = shalt.err (!%p71_p2)
}
   0x8   :  { %s75_s18 = scalar_lea.vmem %s17_s10, 128  ;;  %p80_p4 = scmp.lt.s32.totalorder %s17_s10, %s17_s10 }
   0x9   :  { %p76_p3 = scmp.ne.s32.totalorder %s17_s10, %s75_s18  ;;  %p81_p5 = scmp.lt.s32.totalorder %s75_s18, %s75_s18 }
   0xb   :  { %p82_p6 = por %p81_p5, %p80_p4 }
   0xd   :  { %p83_p7 = pnand %p82_p6, %p76_p3 }
   0xf   :  { %86 = shalt.err (!%p83_p7)
}
  0x10   :  { %19 = dma.hbm_to_vmem [thread:$0]  %s158_s1, 128, %s17_s10, [#allocation5]  }
  0x11   :  { %109 = dma.done.wait [#allocation5], 128  }
  0x12   :  { %110 = vsyncadd [#allocation5], 4294967168  ;;  %v25_v0 = vlaneseq  ;;  %s34_s23 = smul.u32 2654435769, %s157_s0  ;;  %s114_s1 = smov [#allocation7]   ;;  %v23_v14 = vld [vmem:[#allocation4] sm:$0xff] }
  0x13   :  { %s54_s24 = sshll.u32 %s114_s1, 4  ;;  %s55_s24 = int_to_ptr.vmem [resolvable:$true] %s54_s24 }
  0x14   :  { %v26_v1 = vshrl.u32 %v25_v0, 7  ;;  %v28_v2 = vand.u32 127, %v25_v0  ;;  %v35_v4 = vstv %s34_s23  ;;  %s87_s0 = scalar_lea.vmem %s55_s24, 128  ;;  %p92_p9 = scmp.lt.s32.totalorder %s55_s24, %s55_s24 }
  0x15   :  { %p88_p8 = scmp.ne.s32.totalorder %s55_s24, %s87_s0  ;;  %p93_p10 = scmp.lt.s32.totalorder %s87_s0, %s87_s0 }
  0x16   :  { %v29_v3 = vmul.u32 128, %v26_v1 }
  0x17   :  { %p94_p11 = por %p93_p10, %p92_p9 }
  0x18   :  { %v32_v5 = vadd.s32 %v29_v3, %v28_v2 }
  0x19   :  { %p95_p12 = pnand %p94_p11, %p88_p8 }
  0x1a   :  { %v36_v6 = vxor.u32 %v35_v4, %v32_v5 }
  0x1c   :  { %v37_v7 = vshrl.u32 %v36_v6, 16 }
  0x1e   :  { %v38_v8 = vxor.u32 %v37_v7, %v36_v6 }
  0x20   :  { %v39_v9 = vmul.u32 2246822507, %v38_v8 }
  0x22   :  { %v40_v10 = vshrl.u32 %v39_v9, 13 }
  0x24   :  { %v41_v11 = vxor.u32 %v40_v10, %v39_v9 }
  0x26   :  { %v42_v12 = vmul.u32 3266489909, %v41_v11 }
  0x28   :  { %v43_v13 = vshrl.u32 %v42_v12, 16 }
  0x2a   :  { %v44_v15 = vxor.u32 %v43_v13, %v42_v12 }
  0x2c   :  { %vm45_vm0 = vcmp.lt.u32.totalorder %v44_v15, 1073741824 }
  0x2d   :  { %v46_v16 = vsel %vm45_vm0, 0, %v23_v14 }
  0x2e   :  { %47 = vst [vmem:[#allocation7] sm:$0xff] %v46_v16 }
  0x2f   :  { %98 = shalt.err (!%p95_p12)
}
  0x30   :  { %s99_s27 = scalar_lea.hbm %s159_s2, 128 }
  0x31   :  { %p100_p13 = scmp.ne.s32.totalorder %s159_s2, %s99_s27  ;;  %p103_p0 = scmp.lt.u32.totalorder %s99_s27, %s159_s2 }
  0x33   :  { %p105_p1 = pnand %p103_p0, %p100_p13 }
  0x35   :  { %108 = shalt.err (!%p105_p1)
}
  0x36   :  { %57 = dma.vmem_to_hbm [thread:$0]  %s55_s24, 128, %s159_s2, [#allocation6]  }
  0x37   :  { %111 = dma.done.wait [#allocation6], 128  }
  0x38   :  { %112 = vsyncadd [#allocation6], 4294967168 }
  0x39   :  { %61 = vsyncpa [#allocation5], 1 }
  0x3a   :  { %62 = vsyncpa [#allocation6], 1 }

</bundles_post_ra>
